<compile_context>
chip_gen: v7x
topology: tpu7x:2x2x1
jax: 0.10.0
libtpu: 0.0.40
codegen_flags: <defaults>
</compile_context>

<pallas_src>
import jax
import jax.numpy as jnp
from jax.experimental import pallas as pl
from jax.experimental.pallas import tpu as pltpu


def _pos_embed_kernel(x_ref, w_ref, b_ref, pos_ref, o_ref):
    """One grid step = Bt batch elements: project all their patches at once."""
    bt, p, k = x_ref.shape
    e = w_ref.shape[1]

    # (Bt, P, K) -> (Bt*P, K): lane axis K preserved, sublane-only reshape.
    x2 = x_ref[...].reshape(bt * p, k)

    # Single MXU matmul for the whole batch tile, f32 accumulation.
    y = jnp.dot(x2, w_ref[...], preferred_element_type=jnp.float32)   # (Bt*P, E)
    y = y + b_ref[...]                                                # bias (1, E)

    # Add learned positions, broadcast over the batch-tile axis.
    y = y.reshape(bt, p, e) + pos_ref[...][None, :, :]                # (Bt, P, E)

    o_ref[...] = y.astype(o_ref.dtype)


def position_embedding(x, params, *, patch_size):
    """x: (B, C, H, W) float32.

    params:
      w   : (C*patch_size**2, emb_size)  -- Linear weight, stored as (in, out)
      b   : (1, emb_size)                -- Linear bias
      pos : ((H//ps)*(W//ps), emb_size)  -- positional embedding
    """
    B, C, H, W = x.shape
    ps = patch_size
    assert H % ps == 0 and W % ps == 0
    h, w = H // ps, W // ps
    P = h * w                     # patches per image
    K = C * ps * ps               # patch feature dim
    E = params["w"].shape[1]      # embedding size
    assert params["w"].shape == (K, E)
    assert params["pos"].shape == (P, E)
    assert params["b"].shape == (1, E)

    # Patchify wrapper-side (layout plumbing only):
    #   'b c (h s1) (w s2) -> b (h w) (c s1 s2)'
    patches = (x.reshape(B, C, h, ps, w, ps)
                 .transpose(0, 2, 4, 1, 3, 5)
                 .reshape(B, P, K))

    # Batch tile: largest divisor of B whose (Bt*P) row count stays <= ~512
    # and whose per-step VMEM footprint (x tile + out tile, double-buffered,
    # plus resident params) stays well under the scoped-VMEM default.
    vmem_budget = 24 * 1024 * 1024
    resident = 4 * (K * E + E + P * E)
    bt = 1
    for d in range(1, B + 1):
        if B % d != 0:
            continue
        if d * P > max(P, 512):
            continue
        tile_bytes = 4 * d * P * (K + E) * 2          # in + out, double-buffered
        if resident + tile_bytes <= vmem_budget:
            bt = d
    grid = (B // bt,)

    flops = 2 * B * P * K * E + 2 * B * P * E           # matmul + bias + pos add
    bytes_accessed = 4 * (B * P * K + K * E + E + P * E + B * P * E)
    cost = pl.CostEstimate(flops=flops, transcendentals=0,
                           bytes_accessed=bytes_accessed)

    return pl.pallas_call(
        _pos_embed_kernel,
        out_shape=jax.ShapeDtypeStruct((B, P, E), x.dtype),
        grid=grid,
        in_specs=[
            pl.BlockSpec((bt, P, K), lambda i: (i, 0, 0)),   # patches tile
            pl.BlockSpec((K, E), lambda i: (0, 0)),          # weight (resident)
            pl.BlockSpec((1, E), lambda i: (0, 0)),          # bias   (resident)
            pl.BlockSpec((P, E), lambda i: (0, 0)),          # positions (resident)
        ],
        out_specs=pl.BlockSpec((bt, P, E), lambda i: (i, 0, 0)),
        compiler_params=pltpu.CompilerParams(
            dimension_semantics=("parallel",)),
        cost_estimate=cost,
    )(patches, params["w"], params["b"], params["pos"])


def _reference(x, params, *, patch_size):
    """Pure-JAX reference mirroring the PyTorch module, for validation."""
    B, C, H, W = x.shape
    ps = patch_size
    h, w = H // ps, W // ps
    patches = (x.reshape(B, C, h, ps, w, ps)
                 .transpose(0, 2, 4, 1, 3, 5)
                 .reshape(B, h * w, C * ps * ps))
    y = patches @ params["w"] + params["b"]
    return y + params["pos"][None, :, :]


if __name__ == "__main__":
    # Small shapes consistent with the module: batch=2, in_chs=4, im_size=16,
    # patch_size=4, emb_size=32  ->  patches P=16, patch dim K=64.
    B, C, IM, PS, E = 2, 4, 16, 4, 32
    P = (IM // PS) ** 2
    K = C * PS * PS

    key = jax.random.PRNGKey(0)
    ks = jax.random.split(key, 4)
    init = lambda k, shape, scale: (scale * jax.random.normal(k, shape)).astype(jnp.float32)

    params = {
        "w":   init(ks[0], (K, E), 0.05),
        "b":   init(ks[1], (1, E), 0.05),
        "pos": init(ks[2], (P, E), 1.0),
    }
    x = init(ks[3], (B, C, IM, IM), 1.0)

    out = position_embedding(x, params, patch_size=PS)
    out = jax.block_until_ready(out)

    ref = _reference(x, params, patch_size=PS)
    assert out.shape == (B, P, E)
    assert jnp.allclose(out, ref, atol=2e-5, rtol=2e-5), "kernel mismatch vs reference"

    print("KERNEL_OK")
</pallas_src>

<mosaic_0001>
module attributes {stable_mosaic.version = 11 : i64} {
  func.func @_pos_embed_kernel(%arg0: i32, %arg1: memref<2x16x64xf32, #tpu.memory_space<vmem>>, %arg2: memref<64x32xf32, #tpu.memory_space<vmem>>, %arg3: memref<1x32xf32, #tpu.memory_space<vmem>>, %arg4: memref<16x32xf32, #tpu.memory_space<vmem>>, %arg5: memref<2x16x32xf32, #tpu.memory_space<vmem>>) attributes {dimension_semantics = [#tpu.dimension_semantics<parallel>], iteration_bounds = array<i64: 1>, scalar_prefetch = 0 : i64, scratch_operands = 0 : i64, tpu.core_type = #tpu.core_type<tc>, window_params = [{transform_indices = @transform_0, window_bounds = array<i64: 2, 16, 64>}, {pipeline_mode = #tpu.pipeline_mode<synchronous>, transform_indices = @transform_1, window_bounds = array<i64: 64, 32>}, {pipeline_mode = #tpu.pipeline_mode<synchronous>, transform_indices = @transform_2, window_bounds = array<i64: 1, 32>}, {pipeline_mode = #tpu.pipeline_mode<synchronous>, transform_indices = @transform_3, window_bounds = array<i64: 16, 32>}, {transform_indices = @transform_4, window_bounds = array<i64: 2, 16, 32>}]} {
    %c0 = arith.constant 0 : index
    %c0_0 = arith.constant 0 : index
    %c0_1 = arith.constant 0 : index
    %0 = vector.load %arg1[%c0, %c0_0, %c0_1] : memref<2x16x64xf32, #tpu.memory_space<vmem>>, vector<2x16x64xf32>
    %1 = vector.shape_cast %0 : vector<2x16x64xf32> to vector<32x64xf32>
    %c0_2 = arith.constant 0 : index
    %c0_3 = arith.constant 0 : index
    %2 = vector.load %arg2[%c0_2, %c0_3] : memref<64x32xf32, #tpu.memory_space<vmem>>, vector<64x32xf32>
    %cst = arith.constant dense<0.000000e+00> : vector<32x32xf32>
    %3 = tpu.matmul %1, %2, %cst {dimension_numbers = #tpu.dot_dimension_numbers<[1], [0], [0], [1], [0, 0, 1, 1], [], []>} : vector<32x64xf32>, vector<64x32xf32>, vector<32x32xf32> -> vector<32x32xf32>
    %c0_4 = arith.constant 0 : index
    %c0_5 = arith.constant 0 : index
    %4 = vector.load %arg3[%c0_4, %c0_5] : memref<1x32xf32, #tpu.memory_space<vmem>>, vector<1x32xf32>
    %5 = vector.broadcast %4 : vector<1x32xf32> to vector<32x32xf32>
    %6 = arith.addf %3, %5 : vector<32x32xf32>
    %7 = vector.shape_cast %6 : vector<32x32xf32> to vector<2x16x32xf32>
    %c0_6 = arith.constant 0 : index
    %c0_7 = arith.constant 0 : index
    %8 = vector.load %arg4[%c0_6, %c0_7] : memref<16x32xf32, #tpu.memory_space<vmem>>, vector<16x32xf32>
    %9 = vector.shape_cast %8 : vector<16x32xf32> to vector<1x16x32xf32>
    %10 = vector.broadcast %9 : vector<1x16x32xf32> to vector<2x16x32xf32>
    %11 = arith.addf %7, %10 : vector<2x16x32xf32>
    %c0_8 = arith.constant 0 : index
    %c0_9 = arith.constant 0 : index
    %c0_10 = arith.constant 0 : index
    %12 = vector.load %arg5[%c0_8, %c0_9, %c0_10] : memref<2x16x32xf32, #tpu.memory_space<vmem>>, vector<2x16x32xf32>
    tpu.vector_store %arg5[%c0_8, %c0_9, %c0_10], %11 {strides = array<i32>} : memref<2x16x32xf32, #tpu.memory_space<vmem>>, vector<2x16x32xf32>,
    return
  }
  func.func @transform_0(%arg0: i32) -> (i32, i32, i32) {
    %c0_i32 = arith.constant 0 : i32
    %c0_i32_0 = arith.constant 0 : i32
    %c0_i32_1 = arith.constant 0 : i32
    return %arg0, %c0_i32, %c0_i32_0 : i32, i32, i32
  }
  func.func @transform_1(%arg0: i32) -> (i32, i32) {
    %c0_i32 = arith.constant 0 : i32
    %c0_i32_0 = arith.constant 0 : i32
    %c0_i32_1 = arith.constant 0 : i32
    return %c0_i32, %c0_i32_0 : i32, i32
  }
  func.func @transform_2(%arg0: i32) -> (i32, i32) {
    %c0_i32 = arith.constant 0 : i32
    %c0_i32_0 = arith.constant 0 : i32
    %c0_i32_1 = arith.constant 0 : i32
    return %c0_i32, %c0_i32_0 : i32, i32
  }
  func.func @transform_3(%arg0: i32) -> (i32, i32) {
    %c0_i32 = arith.constant 0 : i32
    %c0_i32_0 = arith.constant 0 : i32
    %c0_i32_1 = arith.constant 0 : i32
    return %c0_i32, %c0_i32_0 : i32, i32
  }
  func.func @transform_4(%arg0: i32) -> (i32, i32, i32) {
    %c0_i32 = arith.constant 0 : i32
    %c0_i32_0 = arith.constant 0 : i32
    %c0_i32_1 = arith.constant 0 : i32
    return %arg0, %c0_i32, %c0_i32_0 : i32, i32, i32
  }
}

</mosaic_0001>

<bundles_post_ra>
// kernel: tpu_custom_call.1
= control target key start
LH: loop header
LB: loop body
LE: loop exit
PB: predicated region body
PF: predicated region fallthrough
CT: control target
= control target key end

     0   :  { %vm37_vm0 = vcmask 523264   ;;  %s341_s0 = inlined_call_operand.vmem [shape: f32[2,16,64], index: 0, kind: input, shape index: {}]   ;;  %s342_s1 = inlined_call_operand.vmem [shape: f32[64,32], index: 1, kind: input, shape index: {}]   ;;  %s343_s2 = inlined_call_operand.vmem [shape: f32[1,32], index: 2, kind: input, shape index: {}]   ;;  %s344_s3 = inlined_call_operand.vmem [shape: f32[16,32], index: 3, kind: input, shape index: {}]   ;;  %s345_s4 = inlined_call_operand.hbm [shape: f32[2,16,32], index: 4, kind: output, shape index: {}]  }
   0x1   :  { %v22_v0 = vld [vmem:[%s342_s1] sm:$0xff]  ;;  %v23_v1 = vld [vmem:[%s342_s1 + $0x8] sm:$0xff]  ;;  %v24_v2 = vld [vmem:[%s342_s1 + $0x10] sm:$0xff] }
   0x2   :  { %v201_v3 = vpack.c.bf16 %v23_v1, %v22_v0  ;;  %v25_v4 = vld [vmem:[%s342_s1 + $0x18] sm:$0xff]  ;;  %v26_v6 = vld [vmem:[%s342_s1 + $0x20] sm:$0xff]  ;;  %v27_v7 = vld [vmem:[%s342_s1 + $0x28] sm:$0xff] }
   0x3   :  { %v205_v5 = vpack.c.bf16 %v25_v4, %v24_v2  ;;  %v18_v8 = vld [vmem:[%s341_s0] sm:$0xff]  ;;  %v20_v9 = vld [vmem:[%s341_s0 + $0x10] sm:$0xff] }
   0x4   :  { %202 = vmatprep.subr.bf16.mxu0 %v201_v3  ;;  %217 = vmatprep.subr.bf16.mxu1 %v201_v3 }
   0x5   :  { %204 = vmatpush3.bf16.msra.mxu0 %v201_v3  ;;  %221 = vmatpush3.bf16.msra.mxu1 %v201_v3 }
   0x6   :  { %9 = vsyncpa [#allocation3], 0  ;;  %206 = vmatprep.subr.bf16.mxu0 %v205_v5  ;;  %218 = vmatprep.subr.bf16.mxu1 %v205_v5  ;;  %v209_v10 = vpack.c.bf16 %v27_v7, %v26_v6  ;;  %v28_v11 = vld [vmem:[%s342_s1 + $0x30] sm:$0xff]  ;;  %v29_v12 = vld [vmem:[%s342_s1 + $0x38] sm:$0xff]  ;;  %s252_s16 = smov [#allocation2]   ;;  %vm141_vm1 = vcmask 261120  }
   0x7   :  { %195 = vmatprep.mubr.msk.f32.mxu0 %vm37_vm0, %v18_v8  ;;  %198 = vmatprep.mubr.msk.f32.mxu1 %vm37_vm0, %v20_v9  ;;  %v213_v13 = vpack.c.bf16 %v29_v12, %v28_v11  ;;  %v19_v14 = vld [vmem:[%s341_s0 + $0x8] sm:$0xff]  ;;  %v21_v15 = vld [vmem:[%s341_s0 + $0x18] sm:$0xff]  ;;  %v162_v16 = vld [vmem:[%s343_s2] ss:$0 sm:$0xff]  ;;  %s151_s17 = sshll.u32 %s252_s16, 4  ;;  %s152_s17 = int_to_ptr.vmem [resolvable:$true] %s151_s17 }
   0x8   :  { %v136_v18 = vld [vmem:[%s344_s3 + $0x8] sm:$0xff]  ;;  %v135_v23 = vld [vmem:[%s344_s3] sm:$0xff]  ;;  %s228_s2 = scalar_lea.vmem %s152_s17, 512  ;;  %p233_p1 = scmp.lt.s32.totalorder %s152_s17, %s152_s17 }
   0x9   :  { %208 = vmatpush3.bf16.msra.mxu0 %v205_v5  ;;  %222 = vmatpush3.bf16.msra.mxu1 %v205_v5  ;;  %p229_p0 = scmp.ne.s32.totalorder %s152_s17, %s228_s2  ;;  %p234_p2 = scmp.lt.s32.totalorder %s228_s2, %s228_s2 }
   0xa   :  { %210 = vmatprep.subr.bf16.mxu0 %v209_v10  ;;  %219 = vmatprep.subr.bf16.mxu1 %v209_v10 }
   0xb   :  { %p235_p3 = por %p234_p2, %p233_p1 }
   0xd   :  { %212 = vmatpush3.bf16.msra.mxu0 %v209_v10  ;;  %223 = vmatpush3.bf16.msra.mxu1 %v209_v10  ;;  %p236_p4 = pnand %p235_p3, %p229_p0 }
   0xe   :  { %214 = vmatprep.subr.bf16.mxu0 %v213_v13  ;;  %220 = vmatprep.subr.bf16.mxu1 %v213_v13 }
  0x11   :  { %216 = vmatpush3.bf16.msra.mxu0 %v213_v13  ;;  %224 = vmatpush3.bf16.msra.mxu1 %v213_v13 }
  0x14   :  { %196 = vmatmul.mubr.msk.f32.vlgmr.msra.gmra.mrb[0].mxu0 %vm37_vm0, %v19_v14  ;;  %199 = vmatmul.mubr.msk.f32.vlgmr.msra.gmra.mrb[0].mxu1 %vm37_vm0, %v21_v15 }
  0xe7   :  { %v197_v17 = vpop.f32.mrb[0].mxu0  ;;  %v200_v19 = vpop.f32.mrb[0].mxu1 }
  0xe8   :  { %v122_v20 = vadd.f32 %v197_v17, %v162_v16  ;;  %v132_v21 = vadd.f32 %v200_v19, %v162_v16  ;;  %v116_v22 = vpop.f32.mrb[1].mxu0  ;;  %v126_v24 = vpop.f32.mrb[1].mxu1 }
  0xe9   :  { %v117_v25 = vadd.f32 %v162_v16, %v116_v22  ;;  %v127_v26 = vadd.f32 %v162_v16, %v126_v24 }
  0xea   :  { %v138_v27 = vadd.f32 %v136_v18, %v122_v20  ;;  %v140_v28 = vadd.f32 %v136_v18, %v132_v21 }
  0xeb   :  { %v137_v29 = vadd.f32 %v135_v23, %v117_v25  ;;  %v139_v30 = vadd.f32 %v135_v23, %v127_v26 }
  0xec   :  { %143 = vst.msk [vmem:[#allocation2 + $0x8] sm:$0xff] %vm141_vm1, %v138_v27  ;;  %145 = vst.msk [vmem:[#allocation2 + $0x18] sm:$0xff] %vm141_vm1, %v140_v28 }
  0xed   :  { %142 = vst.msk [vmem:[#allocation2] sm:$0xff] %vm141_vm1, %v137_v29  ;;  %144 = vst.msk [vmem:[#allocation2 + $0x10] sm:$0xff] %vm141_vm1, %v139_v30 }
  0xee   :  { %239 = shalt.err (!%p236_p4)
}
  0xef   :  { %s240_s20 = scalar_lea.hbm %s345_s4, 512 }
  0xf0   :  { %p241_p5 = scmp.ne.s32.totalorder %s345_s4, %s240_s20  ;;  %p244_p6 = scmp.lt.u32.totalorder %s240_s20, %s345_s4 }
  0xf2   :  { %p246_p7 = pnand %p244_p6, %p241_p5 }
  0xf4   :  { %249 = shalt.err (!%p246_p7)
}
  0xf5   :  { %s253_s25 = smov 128   ;;  %s254_s26 = smov 8  }
  0xf6   :  { %157 = dma.vmem_to_hbm [thread:$0]  %s152_s17, 512, %s345_s4, [#allocation3], %s253_s25, %s253_s25, %s254_s26  }
  0xf7   :  { %250 = dma.done.wait [#allocation3], 512  }
  0xf8   :  { %251 = vsyncadd [#allocation3], 4294966784 }
  0xf9   :  { %161 = vsyncpa [#allocation3], 1 }

</bundles_post_ra>
